<compile_context>
chip_gen: v5e
topology: v5e:2x2
jax: 0.10.0
libtpu: 0.0.40
codegen_flags: <defaults>
</compile_context>

<pallas_src>
import math

import jax
import jax.numpy as jnp
from jax.experimental import pallas as pl
from jax.experimental.pallas import tpu as pltpu

# ---------------- small config (consistent with the module) ----------------
N_MELS  = 16                 # config.n_mels
N_EMBD  = 32                 # config.n_embd
N_HEAD  = 4                  # config.n_head
N_LAYER = 2                  # config.n_layer
BLOCK_T = 8                  # config.block_size (sequence length T)
BATCH   = 2
DK      = N_EMBD // N_HEAD   # 8
BT      = BATCH * BLOCK_T    # 16  (all tokens of all batch elements)
HBT     = N_HEAD * BT        # 64  (head-blocked score width)
TM      = BLOCK_T * N_MELS   # 128 (lane-dense output width)
LN_EPS  = 1e-5

# ---- slabD row offsets (last dim = N_EMBD = 32) ----
ROW_WE    = 0                         # W_embed                (N_MELS rows)
ROW_PB    = ROW_WE + N_MELS           # pos_emb tiled + b_emb  (BT rows)
ROW_G     = ROW_PB + BT               # LN gamma               (1)
ROW_B     = ROW_G + 1                 # LN beta                (1)
ROW_BPROJ = ROW_B + 1                 # c_proj bias per layer  (N_LAYER)
ROW_BATTN = ROW_BPROJ + N_LAYER       # c_attn bias, 3 rows/layer (3*N_LAYER)
ROW_WPROJ = ROW_BATTN + 3 * N_LAYER   # c_proj weights stacked (N_LAYER*N_EMBD)
ROW_HMASK = ROW_WPROJ + N_LAYER * N_EMBD  # head block-diag mask (HBT rows)
SLABD_ROWS = ROW_HMASK + HBT          # 170

# ---- slab128 row offsets (last dim = TM = 128) ----
R_WATTN = 0                           # c_attn weights, zero-padded to 128 cols
R_ONES  = R_WATTN + N_LAYER * N_EMBD  # block-diag all-ones (HBT rows, cols 0:HBT)
R_BIAS  = R_ONES + HBT                # cross-batch -1e30 bias (BT rows, cols 0:HBT)
R_WH    = R_BIAS + BT                 # head weight tiled T times (N_EMBD rows)
R_BH    = R_WH + N_EMBD               # head bias tiled (1 row)
R_PICK  = R_BH + 1                    # output column-block selector (BT rows)
SLAB128_ROWS = R_PICK + BT            # 193


def audiogpt_kernel(x_ref, slabd_ref, slab128_ref, out_ref):
    """Whole-batch forward in one invocation. All math in f32."""
    f32 = jnp.float32
    x = x_ref[...].astype(f32)                                        # (BT, M)

    # embed(x) + pos_emb (+ cond = 0); pos & embed bias pre-tiled on host
    w_e = slabd_ref[ROW_WE:ROW_WE + N_MELS, :]                        # (M, D)
    pb  = slabd_ref[ROW_PB:ROW_PB + BT, :]                            # (BT, D)
    h = jnp.dot(x, w_e, preferred_element_type=f32) + pb              # (BT, D)

    # host-packed constants
    hmask    = slabd_ref[ROW_HMASK:ROW_HMASK + HBT, :]                # (HBT, D)
    ones_blk = slab128_ref[R_ONES:R_ONES + HBT, 0:HBT]                # (HBT, HBT)
    bias_all = slab128_ref[R_BIAS:R_BIAS + BT, 0:HBT]                 # (BT, HBT)

    scale = 1.0 / math.sqrt(DK)
    for l in range(N_LAYER):
        # fused q/k/v projection: ONE matmul per layer (cols 96:128 are zero pad)
        w_attn = slab128_ref[R_WATTN + l * N_EMBD:
                             R_WATTN + (l + 1) * N_EMBD, :]           # (D, 128)
        qkv = jnp.dot(h, w_attn, preferred_element_type=f32)          # (BT, 128)
        bq = slabd_ref[ROW_BATTN + 3 * l + 0:ROW_BATTN + 3 * l + 1, :]
        bk = slabd_ref[ROW_BATTN + 3 * l + 1:ROW_BATTN + 3 * l + 2, :]
        bv = slabd_ref[ROW_BATTN + 3 * l + 2:ROW_BATTN + 3 * l + 3, :]
        q = qkv[:, 0:N_EMBD] + bq                                     # (BT, D)
        k = qkv[:, N_EMBD:2 * N_EMBD] + bk                            # (BT, D)
        v = qkv[:, 2 * N_EMBD:3 * N_EMBD] + bv                        # (BT, D)

        # all-head scores in ONE matmul against a head-block-diagonal K slab:
        #   k_blk[j*BT+m, h*DK+d] = k[m, h*DK+d] * (j == h)
        #   scores[n, j*BT+m]     = sum_d q[n, j*DK+d] * k[m, j*DK+d]
        k_blk = jnp.concatenate([k] * N_HEAD, axis=0) * hmask         # (HBT, D)
        logits = jnp.einsum('nc,mc->nm', q, k_blk,
                            preferred_element_type=f32) * scale + bias_all
        # segmented softmax over each head's BT-wide column block.
        # masked logits (-1e30) underflow exp to exactly 0; scores are tiny,
        # so the max-subtraction stabilization is unnecessary.
        p = jnp.exp(logits)                                           # (BT, HBT)
        denom = jnp.dot(p, ones_blk, preferred_element_type=f32)      # block row sums
        p = p * pl.reciprocal(denom, approx=True)

        # weighted values against the block-diagonal V slab: result is already
        # in merged-head (BT, D) layout -> no head-concat / transpose needed.
        v_blk = jnp.concatenate([v] * N_HEAD, axis=0) * hmask         # (HBT, D)
        y = jnp.dot(p, v_blk, preferred_element_type=f32)             # (BT, D)

        # fused c_proj: ONE matmul per layer (note: no residual in this model)
        w_proj = slabd_ref[ROW_WPROJ + l * N_EMBD:
                           ROW_WPROJ + (l + 1) * N_EMBD, :]           # (D, D)
        b_proj = slabd_ref[ROW_BPROJ + l:ROW_BPROJ + l + 1, :]        # (1, D)
        h = jnp.dot(y, w_proj, preferred_element_type=f32) + b_proj   # (BT, D)

    # LayerNorm
    gamma = slabd_ref[ROW_G:ROW_G + 1, :]
    beta  = slabd_ref[ROW_B:ROW_B + 1, :]
    mu  = jnp.mean(h, axis=-1, keepdims=True)
    var = jnp.mean((h - mu) ** 2, axis=-1, keepdims=True)
    hn = (h - mu) * jax.lax.rsqrt(var + LN_EPS) * gamma + beta        # (BT, D)

    # output head, produced lane-dense as (BATCH, T*M):
    #   out[b, t*M + m] = (hn @ Wh + bh)[b*T + t, m]
    wh   = slab128_ref[R_WH:R_WH + N_EMBD, :]                         # (D, 128)
    bh   = slab128_ref[R_BH:R_BH + 1, :]                              # (1, 128)
    pick = slab128_ref[R_PICK:R_PICK + BT, :]                         # (BT, 128)
    out_big = jnp.dot(hn, wh, preferred_element_type=f32) * pick      # (BT, 128)
    for b in range(BATCH):
        row = jnp.sum(out_big[b * BLOCK_T:(b + 1) * BLOCK_T, :],
                      axis=0, keepdims=True) + bh                     # (1, 128)
        out_ref[b:b + 1, :] = row.astype(out_ref.dtype)


# ------------------------- host-side param packing --------------------------
def pack_params(p):
    D, M, L, T, H = N_EMBD, N_MELS, N_LAYER, BLOCK_T, N_HEAD
    f32 = jnp.float32

    # ---- slabD (last dim = 32) ----
    posbias = jnp.tile(p["pos"], (BATCH, 1)) + p["be"]                # (BT, D)
    battn_rows = p["battn"][:, 0, :].reshape(L * 3, D)                # (6, D): q,k,v per layer
    wproj_rows = p["wproj"].reshape(L * D, D)                         # (L*D, D)

    # head block-diag mask: hmask[j*BT + m, h*DK + d] = (j == h)
    j_idx = (jnp.arange(HBT) // BT)[:, None]
    h_idx = (jnp.arange(D) // DK)[None, :]
    hmask = (j_idx == h_idx).astype(f32)                              # (HBT, D)

    slabd = jnp.concatenate(
        [p["we"], posbias, p["gamma"], p["beta"], p["bproj"][:, 0, :],
         battn_rows, wproj_rows, hmask], axis=0)
    assert slabd.shape == (SLABD_ROWS, D)

    # ---- slab128 (last dim = 128) ----
    wattn_pad = jnp.concatenate(
        [p["wattn"], jnp.zeros((L, D, TM - 3 * D), f32)], axis=-1
    ).reshape(L * D, TM)                                              # (L*D, 128)

    ja = jnp.arange(HBT) // BT
    ones_blk = (ja[:, None] == ja[None, :]).astype(f32)               # (HBT, HBT)
    ones_pad = jnp.concatenate([ones_blk, jnp.zeros((HBT, TM - HBT), f32)], axis=1)

    bn = jnp.arange(BT) // T                                          # batch of query token
    bm = (jnp.arange(HBT) % BT) // T                                  # batch of key token
    bias_all = jnp.where(bn[:, None] == bm[None, :], 0.0, -1e30).astype(f32)
    bias_pad = jnp.concatenate([bias_all, jnp.zeros((BT, TM - HBT), f32)], axis=1)

    wh_tiled = jnp.tile(p["wh"], (1, T))                              # (D, 128)
    bh_tiled = jnp.tile(p["bh"], (1, T))                              # (1, 128)

    tn = jnp.arange(BT) % T
    tc = jnp.arange(TM) // M
    pick = (tn[:, None] == tc[None, :]).astype(f32)                   # (BT, 128)

    slab128 = jnp.concatenate(
        [wattn_pad, ones_pad, bias_pad, wh_tiled, bh_tiled, pick], axis=0)
    assert slab128.shape == (SLAB128_ROWS, TM)
    return slabd, slab128


def audiogpt_forward(x, params):
    """x: (B, T, M) or (B, 1, T, M).  Returns (B, T, M)."""
    if x.ndim == 4:                      # mirrors `x.squeeze(1)` in PyTorch forward
        x = x[:, 0]
    B, T, M = x.shape
    assert (B, T, M) == (BATCH, BLOCK_T, N_MELS)

    slabd, slab128 = pack_params(params)
    x2 = x.reshape(B * T, M)             # host-side layout plumbing (free)

    out2 = pl.pallas_call(
        audiogpt_kernel,
        out_shape=jax.ShapeDtypeStruct((BATCH, TM), jnp.float32),
        in_specs=[pl.BlockSpec(memory_space=pltpu.MemorySpace.VMEM),
                  pl.BlockSpec(memory_space=pltpu.MemorySpace.VMEM),
                  pl.BlockSpec(memory_space=pltpu.MemorySpace.VMEM)],
        out_specs=pl.BlockSpec(memory_space=pltpu.MemorySpace.VMEM),
        cost_estimate=pl.CostEstimate(flops=1_000_000,
                                      transcendentals=4_200,
                                      bytes_accessed=123_000),
    )(x2, slabd, slab128)

    return out2.reshape(B, T, M)


# ------------------------- pure-JAX reference --------------------------------
def reference_forward(x, p):
    if x.ndim == 4:
        x = x[:, 0]
    h = x @ p["we"] + p["be"]                  # embed
    h = h + p["pos"][None]                     # cond=0 + pos
    scale = 1.0 / math.sqrt(DK)
    for l in range(N_LAYER):
        qkv = h @ p["wattn"][l] + p["battn"][l]
        q, k, v = jnp.split(qkv, 3, axis=-1)
        B, T, _ = q.shape
        rs = lambda a: a.reshape(B, T, N_HEAD, DK).transpose(0, 2, 1, 3)
        q, k, v = rs(q), rs(k), rs(v)
        att = jnp.einsum('bhtd,bhsd->bhts', q, k) * scale
        att = jax.nn.softmax(att, axis=-1)
        y = jnp.einsum('bhts,bhsd->bhtd', att, v)
        y = y.transpose(0, 2, 1, 3).reshape(B, T, N_EMBD)
        h = y @ p["wproj"][l] + p["bproj"][l]
    mu = h.mean(-1, keepdims=True)
    var = ((h - mu) ** 2).mean(-1, keepdims=True)
    h = (h - mu) / jnp.sqrt(var + LN_EPS) * p["gamma"] + p["beta"]
    return h @ p["wh"] + p["bh"]


# ------------------------- deterministic params ------------------------------
def make_params(key):
    ks = jax.random.split(key, 12)
    D, M, L, T = N_EMBD, N_MELS, N_LAYER, BLOCK_T
    s = 0.02
    return {
        "we":    s * jax.random.normal(ks[0], (M, D), jnp.float32),
        "be":    s * jax.random.normal(ks[1], (1, D), jnp.float32),
        "pos":   s * jax.random.normal(ks[2], (T, D), jnp.float32),
        "wattn": s * jax.random.normal(ks[3], (L, D, 3 * D), jnp.float32),
        "battn": s * jax.random.normal(ks[4], (L, 1, 3 * D), jnp.float32),
        "wproj": s * jax.random.normal(ks[5], (L, D, D), jnp.float32),
        "bproj": s * jax.random.normal(ks[6], (L, 1, D), jnp.float32),
        "gamma": jnp.ones((1, D), jnp.float32)
                 + s * jax.random.normal(ks[7], (1, D), jnp.float32),
        "beta":  s * jax.random.normal(ks[8], (1, D), jnp.float32),
        "wh":    s * jax.random.normal(ks[9], (D, M), jnp.float32),
        "bh":    s * jax.random.normal(ks[10], (1, M), jnp.float32),
    }


if __name__ == "__main__":
    key = jax.random.PRNGKey(0)
    k_x, k_p = jax.random.split(key)
    params = make_params(k_p)
    # input mel-spectrogram frames: (B, T, n_mels)
    x = jax.random.normal(k_x, (BATCH, BLOCK_T, N_MELS), jnp.float32)

    out = jax.block_until_ready(audiogpt_forward(x, params))
    ref = reference_forward(x, params)

    assert out.shape == (BATCH, BLOCK_T, N_MELS)
    err = jnp.max(jnp.abs(out - ref))
    assert jnp.allclose(out, ref, atol=1e-3, rtol=1e-3), f"max err {err}"
    print("KERNEL_OK")
</pallas_src>

<mosaic_0001>
module attributes {stable_mosaic.version = 11 : i64} {
  func.func @audiogpt_kernel(%arg0: memref<16x16xf32, #tpu.memory_space<vmem>>, %arg1: memref<170x32xf32, #tpu.memory_space<vmem>>, %arg2: memref<193x128xf32, #tpu.memory_space<vmem>>, %arg3: memref<2x128xf32, #tpu.memory_space<vmem>>) attributes {dimension_semantics = [], scalar_prefetch = 0 : i64, scratch_operands = 0 : i64, tpu.core_type = #tpu.core_type<tc>} {
    %c0 = arith.constant 0 : index
    %c0_0 = arith.constant 0 : index
    %0 = vector.load %arg0[%c0, %c0_0] : memref<16x16xf32, #tpu.memory_space<vmem>>, vector<16x16xf32>
    %c0_1 = arith.constant 0 : index
    %c0_2 = arith.constant 0 : index
    %1 = vector.load %arg1[%c0_1, %c0_2] : memref<170x32xf32, #tpu.memory_space<vmem>>, vector<16x32xf32>
    %c16 = arith.constant 16 : index
    %c0_3 = arith.constant 0 : index
    %2 = vector.load %arg1[%c16, %c0_3] : memref<170x32xf32, #tpu.memory_space<vmem>>, vector<16x32xf32>
    %cst = arith.constant dense<0.000000e+00> : vector<16x32xf32>
    %3 = tpu.matmul %0, %1, %cst {dimension_numbers = #tpu.dot_dimension_numbers<[1], [0], [0], [1], [0, 0, 1, 1], [], []>} : vector<16x16xf32>, vector<16x32xf32>, vector<16x32xf32> -> vector<16x32xf32>
    %4 = arith.addf %3, %2 : vector<16x32xf32>
    %c106 = arith.constant 106 : index
    %c0_4 = arith.constant 0 : index
    %5 = vector.load %arg1[%c106, %c0_4] : memref<170x32xf32, #tpu.memory_space<vmem>>, vector<64x32xf32>
    %c64 = arith.constant 64 : index
    %c0_5 = arith.constant 0 : index
    %6 = vector.load %arg2[%c64, %c0_5] : memref<193x128xf32, #tpu.memory_space<vmem>>, vector<64x64xf32>
    %c128 = arith.constant 128 : index
    %c0_6 = arith.constant 0 : index
    %7 = vector.load %arg2[%c128, %c0_6] : memref<193x128xf32, #tpu.memory_space<vmem>>, vector<16x64xf32>
    %c0_7 = arith.constant 0 : index
    %c0_8 = arith.constant 0 : index
    %8 = vector.load %arg2[%c0_7, %c0_8] : memref<193x128xf32, #tpu.memory_space<vmem>>, vector<32x128xf32>
    %cst_9 = arith.constant dense<0.000000e+00> : vector<16x128xf32>
    %9 = tpu.matmul %4, %8, %cst_9 {dimension_numbers = #tpu.dot_dimension_numbers<[1], [0], [0], [1], [0, 0, 1, 1], [], []>} : vector<16x32xf32>, vector<32x128xf32>, vector<16x128xf32> -> vector<16x128xf32>
    %c36 = arith.constant 36 : index
    %c0_10 = arith.constant 0 : index
    %10 = vector.load %arg1[%c36, %c0_10] : memref<170x32xf32, #tpu.memory_space<vmem>>, vector<1x32xf32>
    %c37 = arith.constant 37 : index
    %c0_11 = arith.constant 0 : index
    %11 = vector.load %arg1[%c37, %c0_11] : memref<170x32xf32, #tpu.memory_space<vmem>>, vector<1x32xf32>
    %c38 = arith.constant 38 : index
    %c0_12 = arith.constant 0 : index
    %12 = vector.load %arg1[%c38, %c0_12] : memref<170x32xf32, #tpu.memory_space<vmem>>, vector<1x32xf32>
    %13 = vector.extract_strided_slice %9 {offsets = [0, 0], sizes = [16, 32], strides = [1, 1]} : vector<16x128xf32> to vector<16x32xf32>
    %14 = vector.broadcast %10 : vector<1x32xf32> to vector<16x32xf32>
    %15 = arith.addf %13, %14 : vector<16x32xf32>
    %16 = vector.extract_strided_slice %9 {offsets = [0, 32], sizes = [16, 32], strides = [1, 1]} : vector<16x128xf32> to vector<16x32xf32>
    %17 = vector.broadcast %11 : vector<1x32xf32> to vector<16x32xf32>
    %18 = arith.addf %16, %17 : vector<16x32xf32>
    %19 = vector.extract_strided_slice %9 {offsets = [0, 64], sizes = [16, 32], strides = [1, 1]} : vector<16x128xf32> to vector<16x32xf32>
    %20 = vector.broadcast %12 : vector<1x32xf32> to vector<16x32xf32>
    %21 = arith.addf %19, %20 : vector<16x32xf32>
    %22 = tpu.concatenate %18, %18, %18, %18 in 0 : vector<16x32xf32>, vector<16x32xf32>, vector<16x32xf32>, vector<16x32xf32> -> vector<64x32xf32>
    %23 = arith.mulf %22, %5 : vector<64x32xf32>
    "tpu.trace_start"() <{level = 10 : i32, message = "nc,mc->nm"}> : () -> ()
    %cst_13 = arith.constant dense<0.000000e+00> : vector<16x64xf32>
    %24 = tpu.matmul %15, %23, %cst_13 {dimension_numbers = #tpu.dot_dimension_numbers<[1], [1], [0], [0], [0, 0, 1, 0], [], []>} : vector<16x32xf32>, vector<64x32xf32>, vector<16x64xf32> -> vector<16x64xf32>
    "tpu.trace_stop"() : () -> ()
    %cst_14 = arith.constant 0.353553385 : f32
    %25 = vector.broadcast %cst_14 : f32 to vector<16x64xf32>
    %26 = arith.mulf %24, %25 : vector<16x64xf32>
    %27 = arith.addf %26, %7 : vector<16x64xf32>
    %28 = math.exp %27 : vector<16x64xf32>
    %cst_15 = arith.constant dense<0.000000e+00> : vector<16x64xf32>
    %29 = tpu.matmul %28, %6, %cst_15 {dimension_numbers = #tpu.dot_dimension_numbers<[1], [0], [0], [1], [0, 0, 1, 1], [], []>} : vector<16x64xf32>, vector<64x64xf32>, vector<16x64xf32> -> vector<16x64xf32>
    %30 = tpu.reciprocal %29 {approx = true} : vector<16x64xf32> -> vector<16x64xf32>
    %31 = arith.mulf %28, %30 : vector<16x64xf32>
    %32 = tpu.concatenate %21, %21, %21, %21 in 0 : vector<16x32xf32>, vector<16x32xf32>, vector<16x32xf32>, vector<16x32xf32> -> vector<64x32xf32>
    %33 = arith.mulf %32, %5 : vector<64x32xf32>
    %cst_16 = arith.constant dense<0.000000e+00> : vector<16x32xf32>
    %34 = tpu.matmul %31, %33, %cst_16 {dimension_numbers = #tpu.dot_dimension_numbers<[1], [0], [0], [1], [0, 0, 1, 1], [], []>} : vector<16x64xf32>, vector<64x32xf32>, vector<16x32xf32> -> vector<16x32xf32>
    %c42 = arith.constant 42 : index
    %c0_17 = arith.constant 0 : index
    %35 = vector.load %arg1[%c42, %c0_17] : memref<170x32xf32, #tpu.memory_space<vmem>>, vector<32x32xf32>
    %c34 = arith.constant 34 : index
    %c0_18 = arith.constant 0 : index
    %36 = vector.load %arg1[%c34, %c0_18] : memref<170x32xf32, #tpu.memory_space<vmem>>, vector<1x32xf32>
    %cst_19 = arith.constant dense<0.000000e+00> : vector<16x32xf32>
    %37 = tpu.matmul %34, %35, %cst_19 {dimension_numbers = #tpu.dot_dimension_numbers<[1], [0], [0], [1], [0, 0, 1, 1], [], []>} : vector<16x32xf32>, vector<32x32xf32>, vector<16x32xf32> -> vector<16x32xf32>
    %38 = vector.broadcast %36 : vector<1x32xf32> to vector<16x32xf32>
    %39 = arith.addf %37, %38 : vector<16x32xf32>
    %c32 = arith.constant 32 : index
    %c0_20 = arith.constant 0 : index
    %40 = vector.load %arg2[%c32, %c0_20] : memref<193x128xf32, #tpu.memory_space<vmem>>, vector<32x128xf32>
    %cst_21 = arith.constant dense<0.000000e+00> : vector<16x128xf32>
    %41 = tpu.matmul %39, %40, %cst_21 {dimension_numbers = #tpu.dot_dimension_numbers<[1], [0], [0], [1], [0, 0, 1, 1], [], []>} : vector<16x32xf32>, vector<32x128xf32>, vector<16x128xf32> -> vector<16x128xf32>
    %c39 = arith.constant 39 : index
    %c0_22 = arith.constant 0 : index
    %42 = vector.load %arg1[%c39, %c0_22] : memref<170x32xf32, #tpu.memory_space<vmem>>, vector<1x32xf32>
    %c40 = arith.constant 40 : index
    %c0_23 = arith.constant 0 : index
    %43 = vector.load %arg1[%c40, %c0_23] : memref<170x32xf32, #tpu.memory_space<vmem>>, vector<1x32xf32>
    %c41 = arith.constant 41 : index
    %c0_24 = arith.constant 0 : index
    %44 = vector.load %arg1[%c41, %c0_24] : memref<170x32xf32, #tpu.memory_space<vmem>>, vector<1x32xf32>
    %45 = vector.extract_strided_slice %41 {offsets = [0, 0], sizes = [16, 32], strides = [1, 1]} : vector<16x128xf32> to vector<16x32xf32>
    %46 = vector.broadcast %42 : vector<1x32xf32> to vector<16x32xf32>
    %47 = arith.addf %45, %46 : vector<16x32xf32>
    %48 = vector.extract_strided_slice %41 {offsets = [0, 32], sizes = [16, 32], strides = [1, 1]} : vector<16x128xf32> to vector<16x32xf32>
    %49 = vector.broadcast %43 : vector<1x32xf32> to vector<16x32xf32>
    %50 = arith.addf %48, %49 : vector<16x32xf32>
    %51 = vector.extract_strided_slice %41 {offsets = [0, 64], sizes = [16, 32], strides = [1, 1]} : vector<16x128xf32> to vector<16x32xf32>
    %52 = vector.broadcast %44 : vector<1x32xf32> to vector<16x32xf32>
    %53 = arith.addf %51, %52 : vector<16x32xf32>
    %54 = tpu.concatenate %50, %50, %50, %50 in 0 : vector<16x32xf32>, vector<16x32xf32>, vector<16x32xf32>, vector<16x32xf32> -> vector<64x32xf32>
    %55 = arith.mulf %54, %5 : vector<64x32xf32>
    "tpu.trace_start"() <{level = 10 : i32, message = "nc,mc->nm"}> : () -> ()
    %cst_25 = arith.constant dense<0.000000e+00> : vector<16x64xf32>
    %56 = tpu.matmul %47, %55, %cst_25 {dimension_numbers = #tpu.dot_dimension_numbers<[1], [1], [0], [0], [0, 0, 1, 0], [], []>} : vector<16x32xf32>, vector<64x32xf32>, vector<16x64xf32> -> vector<16x64xf32>
    "tpu.trace_stop"() : () -> ()
    %cst_26 = arith.constant 0.353553385 : f32
    %57 = vector.broadcast %cst_26 : f32 to vector<16x64xf32>
    %58 = arith.mulf %56, %57 : vector<16x64xf32>
    %59 = arith.addf %58, %7 : vector<16x64xf32>
    %60 = math.exp %59 : vector<16x64xf32>
    %cst_27 = arith.constant dense<0.000000e+00> : vector<16x64xf32>
    %61 = tpu.matmul %60, %6, %cst_27 {dimension_numbers = #tpu.dot_dimension_numbers<[1], [0], [0], [1], [0, 0, 1, 1], [], []>} : vector<16x64xf32>, vector<64x64xf32>, vector<16x64xf32> -> vector<16x64xf32>
    %62 = tpu.reciprocal %61 {approx = true} : vector<16x64xf32> -> vector<16x64xf32>
    %63 = arith.mulf %60, %62 : vector<16x64xf32>
    %64 = tpu.concatenate %53, %53, %53, %53 in 0 : vector<16x32xf32>, vector<16x32xf32>, vector<16x32xf32>, vector<16x32xf32> -> vector<64x32xf32>
    %65 = arith.mulf %64, %5 : vector<64x32xf32>
    %cst_28 = arith.constant dense<0.000000e+00> : vector<16x32xf32>
    %66 = tpu.matmul %63, %65, %cst_28 {dimension_numbers = #tpu.dot_dimension_numbers<[1], [0], [0], [1], [0, 0, 1, 1], [], []>} : vector<16x64xf32>, vector<64x32xf32>, vector<16x32xf32> -> vector<16x32xf32>
    %c74 = arith.constant 74 : index
    %c0_29 = arith.constant 0 : index
    %67 = vector.load %arg1[%c74, %c0_29] : memref<170x32xf32, #tpu.memory_space<vmem>>, vector<32x32xf32>
    %c35 = arith.constant 35 : index
    %c0_30 = arith.constant 0 : index
    %68 = vector.load %arg1[%c35, %c0_30] : memref<170x32xf32, #tpu.memory_space<vmem>>, vector<1x32xf32>
    %cst_31 = arith.constant dense<0.000000e+00> : vector<16x32xf32>
    %69 = tpu.matmul %66, %67, %cst_31 {dimension_numbers = #tpu.dot_dimension_numbers<[1], [0], [0], [1], [0, 0, 1, 1], [], []>} : vector<16x32xf32>, vector<32x32xf32>, vector<16x32xf32> -> vector<16x32xf32>
    %70 = vector.broadcast %68 : vector<1x32xf32> to vector<16x32xf32>
    %71 = arith.addf %69, %70 : vector<16x32xf32>
    %c32_32 = arith.constant 32 : index
    %c0_33 = arith.constant 0 : index
    %72 = vector.load %arg1[%c32_32, %c0_33] : memref<170x32xf32, #tpu.memory_space<vmem>>, vector<1x32xf32>
    %c33 = arith.constant 33 : index
    %c0_34 = arith.constant 0 : index
    %73 = vector.load %arg1[%c33, %c0_34] : memref<170x32xf32, #tpu.memory_space<vmem>>, vector<1x32xf32>
    %cst_35 = arith.constant dense<0.000000e+00> : vector<16xf32>
    %74 = vector.multi_reduction <add>, %71, %cst_35 [1] : vector<16x32xf32> to vector<16xf32>
    %75 = vector.shape_cast %74 : vector<16xf32> to vector<16x1xf32>
    %cst_36 = arith.constant 3.200000e+01 : f32
    %76 = vector.broadcast %cst_36 : f32 to vector<16x1xf32>
    %77 = arith.divf %75, %76 : vector<16x1xf32>
    %78 = vector.broadcast %77 : vector<16x1xf32> to vector<16x32xf32>
    %79 = arith.subf %71, %78 : vector<16x32xf32>
    %80 = arith.mulf %79, %79 : vector<16x32xf32>
    %cst_37 = arith.constant dense<0.000000e+00> : vector<16xf32>
    %81 = vector.multi_reduction <add>, %80, %cst_37 [1] : vector<16x32xf32> to vector<16xf32>
    %82 = vector.shape_cast %81 : vector<16xf32> to vector<16x1xf32>
    %cst_38 = arith.constant 3.200000e+01 : f32
    %83 = vector.broadcast %cst_38 : f32 to vector<16x1xf32>
    %84 = arith.divf %82, %83 : vector<16x1xf32>
    %85 = vector.broadcast %77 : vector<16x1xf32> to vector<16x32xf32>
    %86 = arith.subf %71, %85 : vector<16x32xf32>
    %cst_39 = arith.constant 9.99999974E-6 : f32
    %87 = vector.broadcast %cst_39 : f32 to vector<16x1xf32>
    %88 = arith.addf %84, %87 : vector<16x1xf32>
    %89 = math.rsqrt %88 : vector<16x1xf32>
    %90 = vector.broadcast %89 : vector<16x1xf32> to vector<16x32xf32>
    %91 = arith.mulf %86, %90 : vector<16x32xf32>
    %92 = vector.broadcast %72 : vector<1x32xf32> to vector<16x32xf32>
    %93 = arith.mulf %91, %92 : vector<16x32xf32>
    %94 = vector.broadcast %73 : vector<1x32xf32> to vector<16x32xf32>
    %95 = arith.addf %93, %94 : vector<16x32xf32>
    %c144 = arith.constant 144 : index
    %c0_40 = arith.constant 0 : index
    %96 = vector.load %arg2[%c144, %c0_40] : memref<193x128xf32, #tpu.memory_space<vmem>>, vector<32x128xf32>
    %c176 = arith.constant 176 : index
    %c0_41 = arith.constant 0 : index
    %97 = vector.load %arg2[%c176, %c0_41] : memref<193x128xf32, #tpu.memory_space<vmem>>, vector<1x128xf32>
    %c177 = arith.constant 177 : index
    %c0_42 = arith.constant 0 : index
    %98 = vector.load %arg2[%c177, %c0_42] : memref<193x128xf32, #tpu.memory_space<vmem>>, vector<16x128xf32>
    %cst_43 = arith.constant dense<0.000000e+00> : vector<16x128xf32>
    %99 = tpu.matmul %95, %96, %cst_43 {dimension_numbers = #tpu.dot_dimension_numbers<[1], [0], [0], [1], [0, 0, 1, 1], [], []>} : vector<16x32xf32>, vector<32x128xf32>, vector<16x128xf32> -> vector<16x128xf32>
    %100 = arith.mulf %99, %98 : vector<16x128xf32>
    %101 = vector.extract_strided_slice %100 {offsets = [0, 0], sizes = [8, 128], strides = [1, 1]} : vector<16x128xf32> to vector<8x128xf32>
    %cst_44 = arith.constant dense<0.000000e+00> : vector<128xf32>
    %102 = vector.multi_reduction <add>, %101, %cst_44 [0] : vector<8x128xf32> to vector<128xf32>
    %103 = vector.shape_cast %102 : vector<128xf32> to vector<1x128xf32>
    %104 = arith.addf %103, %97 : vector<1x128xf32>
    %c0_45 = arith.constant 0 : index
    %c0_46 = arith.constant 0 : index
    %105 = vector.load %arg3[%c0_45, %c0_46] : memref<2x128xf32, #tpu.memory_space<vmem>>, vector<1x128xf32>
    tpu.vector_store %arg3[%c0_45, %c0_46], %104 {strides = array<i32>} : memref<2x128xf32, #tpu.memory_space<vmem>>, vector<1x128xf32>,
    %106 = vector.extract_strided_slice %100 {offsets = [8, 0], sizes = [8, 128], strides = [1, 1]} : vector<16x128xf32> to vector<8x128xf32>
    %cst_47 = arith.constant dense<0.000000e+00> : vector<128xf32>
    %107 = vector.multi_reduction <add>, %106, %cst_47 [0] : vector<8x128xf32> to vector<128xf32>
    %108 = vector.shape_cast %107 : vector<128xf32> to vector<1x128xf32>
    %109 = arith.addf %108, %97 : vector<1x128xf32>
    %c1 = arith.constant 1 : index
    %c0_48 = arith.constant 0 : index
    %110 = vector.load %arg3[%c1, %c0_48] : memref<2x128xf32, #tpu.memory_space<vmem>>, vector<1x128xf32>
    tpu.vector_store %arg3[%c1, %c0_48], %109 {strides = array<i32>} : memref<2x128xf32, #tpu.memory_space<vmem>>, vector<1x128xf32>,
    return
  }
}

</mosaic_0001>

<bundles_post_ra>
// kernel: tpu_custom_call.1
= control target key start
LH: loop header
LB: loop body
LE: loop exit
PB: predicated region body
PF: predicated region fallthrough
CT: control target
= control target key end

     0   :  { %vm21_vm0 = vcmask 130048   ;;  %s949_s24 = smov 32   ;;  %s1316_s0 = inlined_call_operand.vmem [shape: f32[16,16], index: 0, kind: input, shape index: {}]   ;;  %s1317_s1 = inlined_call_operand.vmem [shape: f32[170,32], index: 1, kind: input, shape index: {}]   ;;  %s1318_s2 = inlined_call_operand.vmem [shape: f32[193,128], index: 2, kind: input, shape index: {}]   ;;  %s1319_s3 = inlined_call_operand.hbm [shape: f32[2,128], index: 3, kind: output, shape index: {}]  }
   0x1   :  { %v18_v0 = vld [vmem:[%s1317_s1 + $0x8] sm:$0xff]  ;;  %v17_v1 = vld [vmem:[%s1317_s1] sm:$0xff]  ;;  %v72_v3 = vld [vmem:[%s1318_s2 + $0x18] sm:$0xff] }
   0x2   :  { %42 = vmatpush.msra.mxu0 %v18_v0  ;;  %v15_v2 = vld [vmem:[%s1316_s0] sm:$0xff]  ;;  %v71_v4 = vld [vmem:[%s1318_s2 + $0x10] sm:$0xff]  ;;  %92 = vmatpush.msra.mxu1 %v72_v3 }
   0x3   :  { %v891_v5 = vld [vmem:[%s1317_s1 + $0x25] ss:$0 sm:$0xff] }
   0x4   :  { %43 = vmatpush.msra.mxu0 %v17_v1  ;;  %93 = vmatpush.msra.mxu1 %v71_v4 }
   0x5   :  { %806 = vmatmul.msk.f32.vlgmr.msra.gmra.mxu0 %vm21_vm0, %v15_v2  ;;  %111 = vrot.lane.b32.xlu0 %v891_v5, %s949_s24 }
   0x6   :  { %8 = vsyncpa [#allocation3], 0  ;;  %v16_v6 = vld [vmem:[%s1316_s0 + $0x8] sm:$0xff]  ;;  %v69_v8 = vld [vmem:[%s1318_s2] sm:$0xff]  ;;  %vm73_vm1 = vcmask 261120   ;;  %s950_s23 = smov 96  }
   0x7   :  { %v70_v7 = vld [vmem:[%s1318_s2 + $0x8] sm:$0xff]  ;;  %v57_v10 = vld [vmem:[%s1317_s1 + $0x9a] sm:$0xff]  ;;  %v56_v11 = vld [vmem:[%s1317_s1 + $0x92] sm:$0xff]  ;;  %s951_s27 = smov 64   ;;  %vm240_vm2 = vcmask 523264   ;;  %s953_s18 = smov [#allocation2]  }
   0x8   :  { %94 = vmatpush.msra.mxu1 %v70_v7  ;;  %v58_v9 = vld [vmem:[%s1317_s1 + $0xa2] sm:$0xff]  ;;  %143 = vrot.lane.b32.xlu1 %v57_v10, %s949_s24  ;;  %v53_v12 = vld [vmem:[%s1317_s1 + $0x7a] sm:$0xff]  ;;  %v55_v13 = vld [vmem:[%s1317_s1 + $0x8a] sm:$0xff]  ;;  %s797_s21 = sshll.u32 %s1319_s3, 4  ;;  %s798_s21 = int_to_ptr.hbm [resolvable:$true] %s797_s21 }
   0x9   :  { %139 = vrot.lane.b32.xlu2 %v55_v13, %s949_s24  ;;  %v52_v14 = vld [vmem:[%s1317_s1 + $0x72] sm:$0xff]  ;;  %v54_v15 = vld [vmem:[%s1317_s1 + $0x82] sm:$0xff]  ;;  %v51_v16 = vld [vmem:[%s1317_s1 + $0x6a] sm:$0xff] }
   0xa   :  { %95 = vmatpush.msra.mxu1 %v69_v8  ;;  %v19_v17 = vld [vmem:[%s1317_s1 + $0x10] sm:$0xff]  ;;  %v20_v20 = vld [vmem:[%s1317_s1 + $0x18] sm:$0xff]  ;;  %v893_v43 = vld [vmem:[%s1317_s1 + $0x26] ss:$0 sm:$0xff] }
   0xb   :  { %v892_v63 = vld [vmem:[%s1317_s1 + $0x24] ss:$0 sm:$0xff] }
   0xd   :  { %807 = vmatmul.msk.f32.gmra.mxu0 %vm21_vm0, %v16_v6  ;;  %145 = vrot.lane.b32.xlu0 %v58_v9, %s949_s24 }
  0x10   :  { %141 = vrot.lane.b32.xlu1 %v56_v11, %s949_s24 }
  0x11   :  { %137 = vrot.lane.b32.xlu2 %v54_v15, %s949_s24 }
  0x15   :  { %135 = vrot.lane.b32.xlu0 %v53_v12, %s949_s24 }
  0x18   :  { %133 = vrot.lane.b32.xlu1 %v52_v14, %s949_s24 }
  0x19   :  { %131 = vrot.lane.b32.xlu2 %v51_v16, %s949_s24 }
  0x63   :  { %v1042_v24 = vpop.permute.xlu2 %139 }
  0x6b   :  { %v1053_v30 = vpop.permute.xlu2 %137 }
  0x73   :  { %v1068_v38 = vpop.permute.xlu2 %131 }
  0x77   :  { %v112_v23 = vpop.permute.xlu0 %111 }
  0x7a   :  { %v1044_v25 = vpop.permute.xlu1 %143 }
  0x7f   :  { %v1051_v29 = vpop.permute.xlu0 %145 }
  0x82   :  { %v45_v18 = vpop.f32.mrf.mxu0  ;;  %v1058_v33 = vpop.permute.xlu1 %141 }
  0x83   :  { %v46_v19 = vadd.f32 %v45_v18, %v19_v17  ;;  %v66_v18 = vld [vmem:[%s1318_s2 + $0x78] sm:$0xff] }
  0x84   :  { %255 = vmatpush.msra.mxu3 %v66_v18 }
  0x85   :  { %808 = vmatmul.msk.f32.vlgmr.msra.gmra.mxu1 %vm73_vm1, %v46_v19  ;;  %v65_v19 = vld [vmem:[%s1318_s2 + $0x70] sm:$0xff] }
  0x86   :  { %256 = vmatpush.msra.mxu3 %v65_v19 }
  0x87   :  { %v1066_v37 = vpop.permute.xlu0 %135 }
  0x8a   :  { %v48_v21 = vpop.f32.mrf.mxu0  ;;  %v1076_v42 = vpop.permute.xlu1 %133 }
  0x8b   :  { %v49_v22 = vadd.f32 %v48_v21, %v20_v20  ;;  %v64_v20 = vld [vmem:[%s1318_s2 + $0x68] sm:$0xff]  ;;  %v63_v21 = vld [vmem:[%s1318_s2 + $0x60] sm:$0xff] }
  0x8c   :  { %257 = vmatpush.msra.mxu3 %v64_v20 }
  0x8d   :  { %809 = vmatmul.msk.f32.gmra.mxu1 %vm73_vm1, %v49_v22  ;;  %v62_v22 = vld [vmem:[%s1318_s2 + $0x58] sm:$0xff] }
  0x8e   :  { %258 = vmatpush.msra.mxu3 %v63_v21 }
  0x90   :  { %259 = vmatpush.msra.mxu3 %v62_v22 }
 0x102   :  { %v1046_v26 = vpop.f32.mrf.mxu1 }
 0x103   :  { %v114_v27 = vadd.f32 %v112_v23, %v1046_v26  ;;  %v107_v4 = vadd.f32 %v892_v63, %v1046_v26 }
 0x105   :  { %v161_v28 = vmul.f32 %v1044_v25, %v114_v27  ;;  %v157_v39 = vmul.f32 %v1066_v37, %v114_v27  ;;  %v159_v40 = vmul.f32 %v1042_v24, %v114_v27  ;;  %v155_v41 = vmul.f32 %v1068_v38, %v114_v27  ;;  %v59_v27 = vld [vmem:[%s1318_s2 + $0x40] sm:$0xff] }
 0x107   :  { %183 = vrot.lane.b32.xlu1 %v161_v28, %s950_s23 }
 0x10a   :  { %v1055_v31 = vpop.f32.mrf.mxu1 }
 0x10b   :  { %v115_v32 = vadd.f32 %v112_v23, %v1055_v31  ;;  %v61_v23 = vld [vmem:[%s1318_s2 + $0x50] sm:$0xff] }
 0x10c   :  { %260 = vmatpush.msra.mxu3 %v61_v23 }
 0x10d   :  { %v162_v34 = vmul.f32 %v1051_v29, %v115_v32  ;;  %v160_v35 = vmul.f32 %v1058_v33, %v115_v32  ;;  %v158_v36 = vmul.f32 %v1053_v30, %v115_v32  ;;  %v156_v44 = vmul.f32 %v1076_v42, %v115_v32 }
 0x10f   :  { %185 = vrot.lane.b32.xlu0 %v162_v34, %s950_s23  ;;  %181 = vrot.lane.b32.xlu2 %v160_v35, %s950_s23 }
 0x110   :  { %177 = vrot.lane.b32.xlu1 %v158_v36, %s950_s23 }
 0x117   :  { %179 = vrot.lane.b32.xlu0 %v159_v40, %s950_s23  ;;  %175 = vrot.lane.b32.xlu2 %v157_v39, %s950_s23 }
 0x118   :  { %171 = vrot.lane.b32.xlu1 %v155_v41, %s950_s23 }
 0x11f   :  { %118 = vrot.lane.b32.xlu2 %v893_v43, %s951_s27  ;;  %173 = vrot.lane.b32.xlu0 %v156_v44, %s950_s23  ;;  %v1164_v43 = vld [vmem:[%s1318_s2 + $0x80] sm:$0xff] }
 0x120   :  { %286 = vrot.lane.b32.xlu1 %v57_v10, %s951_s27 }
 0x127   :  { %284 = vrot.lane.b32.xlu2 %v56_v11, %s951_s27  ;;  %288 = vrot.lane.b32.xlu0 %v58_v9, %s951_s27  ;;  %v108_v9 = vadd.f32 %v892_v63, %v1055_v31  ;;  %v367_v63 = vld [vmem:[%s1317_s1 + $0x2a] sm:$0xff] }
 0x128   :  { %280 = vrot.lane.b32.xlu1 %v54_v15, %s951_s27 }
 0x12f   :  { %278 = vrot.lane.b32.xlu2 %v53_v12, %s951_s27  ;;  %282 = vrot.lane.b32.xlu0 %v55_v13, %s951_s27 }
 0x130   :  { %274 = vrot.lane.b32.xlu1 %v51_v16, %s951_s27 }
 0x137   :  { %276 = vrot.lane.b32.xlu0 %v52_v14, %s951_s27 }
 0x169   :  { %v182_v45 = vpop.permute.xlu2 %181 }
 0x171   :  { %v176_v47 = vpop.permute.xlu2 %175 }
 0x179   :  { %v184_v46 = vpop.permute.xlu1 %183  ;;  %v119_v50 = vpop.permute.xlu2 %118 }
 0x17a   :  { %v121_v56 = vadd.f32 %v119_v50, %v1046_v26  ;;  %v122_v57 = vadd.f32 %v119_v50, %v1055_v31  ;;  %v60_v26 = vld [vmem:[%s1318_s2 + $0x48] sm:$0xff] }
 0x17b   :  { %261 = vmatpush.msra.mxu3 %v60_v26 }
 0x17d   :  { %262 = vmatpush.msra.mxu3 %v59_v27 }
 0x181   :  { %v186_v48 = vpop.permute.xlu0 %185  ;;  %v1095_v53 = vpop.permute.xlu2 %284 }
 0x182   :  { %v178_v49 = vpop.permute.xlu1 %177  ;;  %810 = vmatpush.xpose.msk.msra.mxu2 %vm73_vm1, %v186_v48  ;;  %v303_v6 = vmul.f32 %v1095_v53, %v122_v57  ;;  %v1170_v48 = vld [vmem:[%s1318_s2 + $0x88] sm:$0xff] }
 0x186   :  { %811 = vmatpush.xpose.msk.msra.mxu2 %vm73_vm1, %v184_v46 }
 0x189   :  { %v180_v51 = vpop.permute.xlu0 %179  ;;  %v1104_v58 = vpop.permute.xlu2 %278 }
 0x18a   :  { %v172_v52 = vpop.permute.xlu1 %171  ;;  %812 = vmatpush.xpose.msk.msra.mxu2 %vm73_vm1, %v182_v45  ;;  %v300_v0 = vmul.f32 %v1104_v58, %v121_v56 }
 0x18e   :  { %813 = vmatpush.xpose.msk.msra.mxu2 %vm73_vm1, %v180_v51 }
 0x191   :  { %v174_v54 = vpop.permute.xlu0 %173 }
 0x192   :  { %v1098_v55 = vpop.permute.xlu1 %286  ;;  %814 = vmatpush.xpose.msk.msra.mxu2 %vm73_vm1, %v178_v49 }
 0x193   :  { %v304_v60 = vmul.f32 %v1098_v55, %v121_v56 }
 0x196   :  { %815 = vmatpush.xpose.msk.msra.mxu2 %vm73_vm1, %v176_v47 }
 0x199   :  { %v1106_v59 = vpop.permute.xlu0 %288 }
 0x19a   :  { %v1109_v61 = vpop.permute.xlu1 %280  ;;  %v305_v62 = vmul.f32 %v1106_v59, %v122_v57  ;;  %816 = vmatpush.xpose.msk.msra.mxu2 %vm73_vm1, %v174_v54 }
 0x19b   :  { %v301_v1 = vmul.f32 %v1109_v61, %v122_v57 }
 0x19c   :  { %v851_v2 = vpack.i.bf16 %v304_v60, %v305_v62  ;;  %v369_v60 = vld [vmem:[%s1317_s1 + $0x3a] sm:$0xff]  ;;  %v368_v62 = vld [vmem:[%s1317_s1 + $0x32] sm:$0xff] }
 0x19d   :  { %v861_v3 = vpack.i.bf16 %v300_v0, %v301_v1 }
 0x19e   :  { %817 = vmatpush.xpose.msk.msra.mxu2 %vm73_vm1, %v172_v52  ;;  %852 = vrot.lane.b32.xlu2 %v851_v2, %s951_s27 }
 0x19f   :  { %862 = vrot.lane.b32.xlu1 %v861_v3, %s951_s27 }
 0x1a1   :  { %818 = vmatmul.msk.f32.vlgmr.msra.gmra.mxu2 %vm73_vm1, %v107_v4  ;;  %v1123_v5 = vpop.permute.xlu0 %282 }
 0x1a2   :  { %v302_v7 = vmul.f32 %v1123_v5, %v121_v56  ;;  %v1129_v10 = vpop.permute.xlu1 %274 }
 0x1a3   :  { %v298_v12 = vmul.f32 %v1129_v10, %v121_v56 }
 0x1a4   :  { %v856_v8 = vpack.i.bf16 %v302_v7, %v303_v6  ;;  %v405_v7 = vld [vmem:[%s1318_s2 + $0x38] sm:$0xff] }
 0x1a5   :  { %424 = vmatpush.msrb.mxu3 %v405_v7 }
 0x1a6   :  { %857 = vrot.lane.b32.xlu0 %v856_v8, %s951_s27  ;;  %v404_v8 = vld [vmem:[%s1318_s2 + $0x30] sm:$0xff] }
 0x1a7   :  { %425 = vmatpush.msrb.mxu3 %v404_v8 }
 0x1a9   :  { %v1131_v11 = vpop.permute.xlu0 %276  ;;  %819 = vmatmul.msk.f32.gmra.mxu2 %vm73_vm1, %v108_v9  ;;  %v403_v9 = vld [vmem:[%s1318_s2 + $0x28] sm:$0xff] }
 0x1aa   :  { %v299_v13 = vmul.f32 %v1131_v11, %v122_v57  ;;  %v370_v57 = vld [vmem:[%s1317_s1 + $0x42] sm:$0xff]  ;;  %426 = vmatpush.msrb.mxu3 %v403_v9 }
 0x1ab   :  { %391 = vmatpush.msrb.mxu1 %v370_v57 }
 0x1ac   :  { %v866_v14 = vpack.i.bf16 %v298_v12, %v299_v13  ;;  %v402_v12 = vld [vmem:[%s1318_s2 + $0x20] sm:$0xff] }
 0x1ad   :  { %392 = vmatpush.msrb.mxu1 %v369_v60  ;;  %427 = vmatpush.msrb.mxu3 %v402_v12 }
 0x1ae   :  { %867 = vrot.lane.b32.xlu2 %v866_v14, %s951_s27 }
 0x1af   :  { %393 = vmatpush.msrb.mxu1 %v368_v62 }
 0x1b1   :  { %394 = vmatpush.msrb.mxu1 %v367_v63 }
 0x1b3   :  { %554 = vmatpush.msra.mxu1 %v66_v18 }
 0x1b5   :  { %555 = vmatpush.msra.mxu1 %v65_v19 }
 0x1b7   :  { %556 = vmatpush.msra.mxu1 %v64_v20 }
 0x1b9   :  { %557 = vmatpush.msra.mxu1 %v63_v21 }
 0x1bb   :  { %558 = vmatpush.msra.mxu1 %v62_v22 }
 0x1bd   :  { %559 = vmatpush.msra.mxu1 %v61_v23 }
 0x1bf   :  { %560 = vmatpush.msra.mxu1 %v60_v26 }
 0x1c1   :  { %561 = vmatpush.msra.mxu1 %v59_v27 }
 0x1f8   :  { %v853_v15 = vpop.permute.xlu2 %852 }
 0x1f9   :  { %v854_v16 = vunpack.i.l.bf16 %v853_v15  ;;  %v855_v17 = vunpack.i.h.bf16 %v853_v15  ;;  %v895_v15 = vld [vmem:[%s1317_s1 + $0x28] ss:$0 sm:$0xff] }
 0x1fa   :  { %443 = vrot.lane.b32.xlu0 %v895_v15, %s949_s24 }
 0x1fb   :  { %352 = vmatpush.msrb.mxu0 %v854_v16  ;;  %v894_v16 = vld [vmem:[%s1317_s1 + $0x22] ss:$0 sm:$0xff] }
 0x1fd   :  { %353 = vmatpush.msrb.mxu0 %v855_v17 }
 0x208   :  { %v868_v36 = vpop.permute.xlu2 %867 }
 0x209   :  { %v869_v40 = vunpack.i.l.bf16 %v868_v36  ;;  %v870_v41 = vunpack.i.h.bf16 %v868_v36 }
 0x211   :  { %v863_v32 = vpop.permute.xlu1 %862 }
 0x212   :  { %v864_v35 = vunpack.i.l.bf16 %v863_v32  ;;  %v865_v39 = vunpack.i.h.bf16 %v863_v32 }
 0x218   :  { %v858_v28 = vpop.permute.xlu0 %857 }
 0x219   :  { %v859_v31 = vunpack.i.l.bf16 %v858_v28  ;;  %v860_v34 = vunpack.i.h.bf16 %v858_v28 }
 0x21b   :  { %354 = vmatpush.msrb.mxu0 %v859_v31 }
 0x21d   :  { %355 = vmatpush.msrb.mxu0 %v860_v34 }
 0x21f   :  { %356 = vmatpush.msrb.mxu0 %v864_v35 }
 0x221   :  { %357 = vmatpush.msrb.mxu0 %v865_v39 }
 0x223   :  { %358 = vmatpush.msrb.mxu0 %v869_v40 }
 0x224   :  { %v226_v44 = vpop.f32.mrf.mxu2 }
 0x225   :  { %v232_v45 = vmul.f32 0.35355338, %v226_v44  ;;  %359 = vmatpush.msrb.mxu0 %v870_v41 }
 0x227   :  { %v234_v46 = vadd.f32 %v232_v45, %v1164_v43 }
 0x229   :  { %v236_v47 = vmul.f32 1.442695, %v234_v46 }
 0x22b   :  { %901 = vpow2.f32 %v236_v47 }
 0x22c   :  { %v229_v49 = vpop.f32.mrf.mxu2 }
 0x22d   :  { %v233_v50 = vmul.f32 0.35355338, %v229_v49 }
 0x22f   :  { %v235_v51 = vadd.f32 %v233_v50, %v1170_v48 }
 0x231   :  { %v902_v52 = vpop.eup %901  ;;  %v238_v54 = vmul.f32 1.442695, %v235_v51 }
 0x232   :  { %820 = vmatmul.msk.f32.vlgmr.msra.gmra.mxu3 %vm240_vm2, %v902_v52 }
 0x233   :  { %903 = vpow2.f32 %v238_v54 }
 0x239   :  { %v904_v56 = vpop.eup %903 }
 0x23a   :  { %821 = vmatmul.msk.f32.gmra.mxu3 %vm240_vm2, %v904_v56 }
 0x26c   :  { %v444_v21 = vpop.permute.xlu0 %443 }
 0x2b5   :  { %v264_v0 = vpop.f32.mrf.mxu3 }
 0x2b6   :  { %905 = vrcp.f32 %v264_v0 }
 0x2bc   :  { %v906_v1 = vpop.eup %905 }
 0x2bd   :  { %v267_v2 = vpop.f32.mrf.mxu3  ;;  %v272_v3 = vmul.f32 %v906_v1, %v902_v52 }
 0x2be   :  { %907 = vrcp.f32 %v267_v2 }
 0x2bf   :  { %822 = vmatmul.msk.f32.vlgmr.msrb.gmra.mxu0 %vm240_vm2, %v272_v3 }
 0x2c4   :  { %v908_v4 = vpop.eup %907 }
 0x2c5   :  { %v273_v6 = vmul.f32 %v908_v4, %v904_v56 }
 0x2c7   :  { %823 = vmatmul.msk.f32.gmra.mxu0 %vm240_vm2, %v273_v6 }
 0x33c   :  { %v361_v13 = vpop.f32.mrf.mxu0 }
 0x33d   :  { %824 = vmatmul.msk.f32.vlgmr.msrb.gmra.mxu1 %vm73_vm1, %v361_v13 }
 0x344   :  { %v364_v14 = vpop.f32.mrf.mxu0 }
 0x345   :  { %825 = vmatmul.msk.f32.gmra.mxu1 %vm73_vm1, %v364_v14 }
 0x3ba   :  { %v396_v17 = vpop.f32.mrf.mxu1 }
 0x3bb   :  { %v397_v18 = vadd.f32 %v894_v16, %v396_v17 }
 0x3bd   :  { %826 = vmatmul.msk.f32.vlgmr.msrb.gmra.mxu3 %vm73_vm1, %v397_v18 }
 0x3c2   :  { %v399_v19 = vpop.f32.mrf.mxu1 }
 0x3c3   :  { %v400_v20 = vadd.f32 %v894_v16, %v399_v19 }
 0x3c5   :  { %827 = vmatmul.msk.f32.gmra.mxu3 %vm73_vm1, %v400_v20 }
 0x440   :  { %v429_v22 = vpop.f32.mrf.mxu3 }
 0x441   :  { %v446_v23 = vadd.f32 %v444_v21, %v429_v22 }
 0x443   :  { %v461_v26 = vmul.f32 %v446_v23, %v1044_v25  ;;  %v459_v35 = vmul.f32 %v446_v23, %v1042_v24  ;;  %v457_v25 = vmul.f32 %v446_v23, %v1066_v37  ;;  %v455_v36 = vmul.f32 %v446_v23, %v1068_v38 }
 0x445   :  { %483 = vrot.lane.b32.xlu2 %v461_v26, %s950_s23 }
 0x448   :  { %v432_v27 = vpop.f32.mrf.mxu3 }
 0x449   :  { %v447_v28 = vadd.f32 %v444_v21, %v432_v27  ;;  %v645_v21 = vld [vmem:[%s1317_s1 + $0x62] sm:$0xff] }
 0x44a   :  { %666 = vmatpush.msra.mxu3 %v645_v21 }
 0x44b   :  { %v462_v31 = vmul.f32 %v447_v28, %v1051_v29  ;;  %v460_v32 = vmul.f32 %v447_v28, %v1058_v33  ;;  %v458_v34 = vmul.f32 %v447_v28, %v1053_v30  ;;  %v897_v29 = vld [vmem:[%s1317_s1 + $0x29] ss:$0 sm:$0xff]  ;;  %v456_v30 = vmul.f32 %v447_v28, %v1076_v42 }
 0x44d   :  { %485 = vrot.lane.b32.xlu1 %v462_v31, %s950_s23  ;;  %481 = vrot.lane.b32.xlu0 %v460_v32, %s950_s23 }
 0x44e   :  { %477 = vrot.lane.b32.xlu2 %v458_v34, %s950_s23 }
 0x455   :  { %479 = vrot.lane.b32.xlu1 %v459_v35, %s950_s23  ;;  %475 = vrot.lane.b32.xlu0 %v457_v25, %s950_s23  ;;  %v898_v25 = vld [vmem:[%s1317_s1 + $0x23] ss:$0 sm:$0xff] }
 0x456   :  { %471 = vrot.lane.b32.xlu2 %v455_v36, %s950_s23 }
 0x45d   :  { %450 = vrot.lane.b32.xlu0 %v897_v29, %s951_s27  ;;  %473 = vrot.lane.b32.xlu1 %v456_v30, %s950_s23 }
 0x49f   :  { %v484_v37 = vpop.permute.xlu2 %483 }
 0x4a8   :  { %v478_v40 = vpop.permute.xlu2 %477 }
 0x4bf   :  { %v486_v24 = vpop.permute.xlu1 %485  ;;  %v482_v33 = vpop.permute.xlu0 %481 }
 0x4c0   :  { %828 = vmatpush.xpose.msk.msra.mxu0 %vm73_vm1, %v486_v24 }
 0x4c4   :  { %829 = vmatpush.xpose.msk.msra.mxu0 %vm73_vm1, %v484_v37 }
 0x4c7   :  { %v476_v38 = vpop.permute.xlu0 %475  ;;  %v480_v39 = vpop.permute.xlu1 %479 }
 0x4c8   :  { %830 = vmatpush.xpose.msk.msra.mxu0 %vm73_vm1, %v482_v33 }
 0x4cc   :  { %831 = vmatpush.xpose.msk.msra.mxu0 %vm73_vm1, %v480_v39 }
 0x4cf   :  { %v451_v41 = vpop.permute.xlu0 %450 }
 0x4d0   :  { %v453_v42 = vadd.f32 %v451_v41, %v429_v22  ;;  %v454_v44 = vadd.f32 %v451_v41, %v432_v27  ;;  %832 = vmatpush.xpose.msk.msra.mxu0 %vm73_vm1, %v478_v40 }
 0x4d2   :  { %v575_v45 = vmul.f32 %v453_v42, %v1104_v58  ;;  %v576_v46 = vmul.f32 %v454_v44, %v1109_v61  ;;  %v577_v47 = vmul.f32 %v453_v42, %v1123_v5  ;;  %v578_v49 = vmul.f32 %v454_v44, %v1095_v53  ;;  %v474_v58 = vpop.permute.xlu1 %473  ;;  %v896_v53 = vld [vmem:[%s1317_s1 + $0x27] ss:$0 sm:$0xff]  ;;  %v472_v61 = vpop.permute.xlu2 %471 }
 0x4d3   :  { %v579_v50 = vmul.f32 %v453_v42, %v1098_v55  ;;  %v580_v51 = vmul.f32 %v454_v44, %v1106_v59  ;;  %v573_v55 = vmul.f32 %v453_v42, %v1129_v10  ;;  %v574_v59 = vmul.f32 %v454_v44, %v1131_v11 }
 0x4d4   :  { %833 = vmatpush.xpose.msk.msra.mxu0 %vm73_vm1, %v476_v38  ;;  %v881_v52 = vpack.i.bf16 %v575_v45, %v576_v46  ;;  %v876_v54 = vpack.i.bf16 %v577_v47, %v578_v49  ;;  %v439_v5 = vadd.f32 %v896_v53, %v429_v22  ;;  %v440_v60 = vadd.f32 %v896_v53, %v432_v27  ;;  %v642_v22 = vld [vmem:[%s1317_s1 + $0x4a] sm:$0xff] }
 0x4d5   :  { %v871_v56 = vpack.i.bf16 %v579_v50, %v580_v51  ;;  %v886_v57 = vpack.i.bf16 %v573_v55, %v574_v59  ;;  %v952_v38 = vmov 32.0   ;;  %v739_v55 = vld [vmem:[%s1318_s2 + $0xa8] sm:$0xff]  ;;  %v738_v59 = vld [vmem:[%s1318_s2 + $0xa0] sm:$0xff] }
 0x4d6   :  { %882 = vrot.lane.b32.xlu0 %v881_v52, %s951_s27  ;;  %877 = vrot.lane.b32.xlu2 %v876_v54, %s951_s27 }
 0x4d7   :  { %872 = vrot.lane.b32.xlu1 %v871_v56, %s951_s27  ;;  %761 = vmatpush.msrb.mxu1 %v739_v55 }
 0x4d8   :  { %834 = vmatpush.xpose.msk.msra.mxu0 %vm73_vm1, %v474_v58 }
 0x4d9   :  { %762 = vmatpush.msrb.mxu1 %v738_v59 }
 0x4dc   :  { %835 = vmatpush.xpose.msk.msra.mxu0 %vm73_vm1, %v472_v61  ;;  %v737_v61 = vld [vmem:[%s1318_s2 + $0x98] sm:$0xff] }
 0x4dd   :  { %763 = vmatpush.msrb.mxu1 %v737_v61 }
 0x4df   :  { %887 = vrot.lane.b32.xlu1 %v886_v57, %s951_s27  ;;  %836 = vmatmul.msk.f32.vlgmr.msra.gmra.mxu0 %vm73_vm1, %v439_v5  ;;  %v736_v5 = vld [vmem:[%s1318_s2 + $0x90] sm:$0xff]  ;;  %s795_s27 = sshll.u32 %s953_s18, 4  ;;  %s796_s27 = int_to_ptr.vmem [resolvable:$true] %s795_s27 }
 0x4e0   :  { %764 = vmatpush.msrb.mxu1 %v736_v5 }
 0x4e7   :  { %837 = vmatmul.msk.f32.gmra.mxu0 %vm73_vm1, %v440_v60 }
 0x530   :  { %v878_v0 = vpop.permute.xlu2 %877 }
 0x531   :  { %v879_v10 = vunpack.i.l.bf16 %v878_v0  ;;  %v880_v2 = vunpack.i.h.bf16 %v878_v0 }
 0x548   :  { %v883_v11 = vpop.permute.xlu0 %882 }
 0x549   :  { %v873_v62 = vpop.permute.xlu1 %872  ;;  %v884_v3 = vunpack.i.l.bf16 %v883_v11  ;;  %v885_v6 = vunpack.i.h.bf16 %v883_v11 }
 0x54a   :  { %v874_v63 = vunpack.i.l.bf16 %v873_v62  ;;  %v875_v1 = vunpack.i.h.bf16 %v873_v62 }
 0x54c   :  { %627 = vmatpush.msrb.mxu2 %v874_v63 }
 0x54e   :  { %628 = vmatpush.msrb.mxu2 %v875_v1 }
 0x550   :  { %629 = vmatpush.msrb.mxu2 %v879_v10 }
 0x551   :  { %v888_v4 = vpop.permute.xlu1 %887 }
 0x552   :  { %630 = vmatpush.msrb.mxu2 %v880_v2  ;;  %v889_v7 = vunpack.i.l.bf16 %v888_v4  ;;  %v890_v8 = vunpack.i.h.bf16 %v888_v4 }
 0x554   :  { %631 = vmatpush.msrb.mxu2 %v884_v3 }
 0x556   :  { %632 = vmatpush.msrb.mxu2 %v885_v6 }
 0x558   :  { %633 = vmatpush.msrb.mxu2 %v889_v7 }
 0x55a   :  { %634 = vmatpush.msrb.mxu2 %v890_v8 }
 0x55c   :  { %v526_v9 = vpop.f32.mrf.mxu0 }
 0x55d   :  { %v532_v12 = vmul.f32 0.35355338, %v526_v9  ;;  %v899_v9 = vld [vmem:[%s1317_s1 + $0x20] ss:$0 sm:$0xff] }
 0x55f   :  { %v534_v13 = vadd.f32 %v532_v12, %v1164_v43  ;;  %v644_v43 = vld [vmem:[%s1317_s1 + $0x5a] sm:$0xff] }
 0x560   :  { %667 = vmatpush.msra.mxu3 %v644_v43 }
 0x561   :  { %v536_v14 = vmul.f32 1.442695, %v534_v13 }
 0x563   :  { %909 = vpow2.f32 %v536_v14 }
 0x564   :  { %v529_v15 = vpop.f32.mrf.mxu0 }
 0x565   :  { %v533_v16 = vmul.f32 0.35355338, %v529_v15  ;;  %v900_v15 = vld [vmem:[%s1317_s1 + $0x21] ss:$0 sm:$0xff] }
 0x567   :  { %v535_v17 = vadd.f32 %v533_v16, %v1170_v48  ;;  %v643_v48 = vld [vmem:[%s1317_s1 + $0x52] sm:$0xff] }
 0x568   :  { %668 = vmatpush.msra.mxu3 %v643_v48 }
 0x569   :  { %v910_v18 = vpop.eup %909  ;;  %v538_v19 = vmul.f32 1.442695, %v535_v17 }
 0x56a   :  { %838 = vmatmul.msk.f32.vlgmr.msra.gmra.mxu1 %vm240_vm2, %v910_v18  ;;  %669 = vmatpush.msra.mxu3 %v642_v22 }
 0x56b   :  { %911 = vpow2.f32 %v538_v19 }
 0x571   :  { %v912_v20 = vpop.eup %911 }
 0x572   :  { %839 = vmatmul.msk.f32.gmra.mxu1 %vm240_vm2, %v912_v20 }
 0x5e7   :  { %v563_v23 = vpop.f32.mrf.mxu1 }
 0x5e8   :  { %913 = vrcp.f32 %v563_v23  ;;  %v741_v23 = vld [vmem:[%s1318_s2 + $0xb1] sm:$0xff] }
 0x5ee   :  { %v914_v26 = vpop.eup %913 }
 0x5ef   :  { %v566_v27 = vpop.f32.mrf.mxu1  ;;  %v571_v28 = vmul.f32 %v914_v26, %v910_v18 }
 0x5f0   :  { %915 = vrcp.f32 %v566_v27 }
 0x5f1   :  { %840 = vmatmul.msk.f32.vlgmr.msrb.gmra.mxu2 %vm240_vm2, %v571_v28  ;;  %917 = vrcp.f32 %v952_v38 }
 0x5f6   :  { %v916_v31 = vpop.eup %915 }
 0x5f7   :  { %v572_v32 = vmul.f32 %v916_v31, %v912_v20  ;;  %v918_v39 = vpop.eup %917 }
 0x5f8   :  { %v686_v40 = vmul.f32 32.0, %v918_v39  ;;  %vm690_vm3 = vweird.f32 %v918_v39 }
 0x5f9   :  { %841 = vmatmul.msk.f32.gmra.mxu2 %vm240_vm2, %v572_v32  ;;  %v742_v32 = vld [vmem:[%s1318_s2 + $0xb9] sm:$0xff] }
 0x5fa   :  { %v687_v41 = vsub.f32 1.0, %v686_v40 }
 0x5fc   :  { %v688_v42 = vmul.f32 %v918_v39, %v687_v41 }
 0x5fe   :  { %v689_v44 = vadd.f32 %v918_v39, %v688_v42 }
 0x600   :  { %v691_v45 = vsel %vm690_vm3, %v918_v39, %v689_v44 }
 0x674   :  { %v636_v34 = vpop.f32.mrf.mxu2 }
 0x675   :  { %842 = vmatmul.msk.f32.vlgmr.msra.gmra.mxu3 %vm73_vm1, %v636_v34 }
 0x67c   :  { %v639_v35 = vpop.f32.mrf.mxu2 }
 0x67d   :  { %843 = vmatmul.msk.f32.gmra.mxu3 %vm73_vm1, %v639_v35 }
 0x6f8   :  { %v671_v36 = vpop.f32.mrf.mxu3 }
 0x6f9   :  { %v672_v29 = vadd.f32 %v898_v25, %v671_v36 }
 0x6fb   :  { %v679_v30 = vsel %vm73_vm1, %v672_v29, 0.0 }
 0x6fc   :  { %680 = vadd.xlane.f32.xlu2 %v679_v30 }
 0x700   :  { %v674_v24 = vpop.f32.mrf.mxu3 }
 0x701   :  { %v675_v33 = vadd.f32 %v898_v25, %v674_v24  ;;  %v740_v24 = vld [vmem:[%s1318_s2 + $0xb0] sm:$0x1] }
 0x703   :  { %v682_v37 = vsel %vm73_vm1, %v675_v33, 0.0 }
 0x704   :  { %683 = vadd.xlane.f32.xlu0 %v682_v37 }
 0x76f   :  { %v681_v46 = vpop.xlane.xlu2 %680 }
 0x770   :  { %v692_v47 = vmul.f32 %v691_v45, %v681_v46 }
 0x772   :  { %v694_v49 = vsub.f32 %v672_v29, %v692_v47 }
 0x774   :  { %v696_v50 = vmul.f32 %v694_v49, %v694_v49 }
 0x776   :  { %v698_v51 = vsel %vm73_vm1, %v696_v50, 0.0 }
 0x777   :  { %699 = vadd.xlane.f32.xlu1 %v698_v51  ;;  %v684_v52 = vpop.xlane.xlu0 %683 }
 0x778   :  { %v693_v54 = vmul.f32 %v691_v45, %v684_v52 }
 0x77a   :  { %v695_v56 = vsub.f32 %v675_v33, %v693_v54 }
 0x77c   :  { %v697_v58 = vmul.f32 %v695_v56, %v695_v56 }
 0x77e   :  { %v701_v53 = vsel %vm73_vm1, %v697_v58, 0.0 }
 0x77f   :  { %702 = vadd.xlane.f32.xlu2 %v701_v53 }
 0x7ea   :  { %v700_v57 = vpop.xlane.xlu1 %699 }
 0x7eb   :  { %v704_v60 = vmul.f32 %v700_v57, %v691_v45 }
 0x7ed   :  { %v706_v62 = vadd.f32 1e-05, %v704_v60 }
 0x7ef   :  { %919 = vrsqrt.f32 %v706_v62  ;;  %vm714_vm5 = vweird.f32 %v706_v62 }
 0x7f2   :  { %v703_v63 = vpop.xlane.xlu2 %702 }
 0x7f3   :  { %v705_v0 = vmul.f32 %v703_v63, %v691_v45 }
 0x7f5   :  { %v920_v1 = vpop.eup %919  ;;  %v707_v10 = vadd.f32 1e-05, %v705_v0 }
 0x7f6   :  { %v709_v11 = vmul.f32 %v920_v1, %v706_v62  ;;  %vm715_vm4 = vweird.f32 %v920_v1 }
 0x7f7   :  { %921 = vrsqrt.f32 %v707_v10  ;;  %vm716_vm6 = vmor %vm714_vm5, %vm715_vm4  ;;  %vm724_vm8 = vweird.f32 %v707_v10 }
 0x7f8   :  { %v710_v2 = vmul.f32 %v920_v1, %v709_v11 }
 0x7fa   :  { %v711_v3 = vmul.f32 0.5, %v710_v2 }
 0x7fc   :  { %v712_v4 = vsub.f32 1.5, %v711_v3 }
 0x7fd   :  { %v922_v6 = vpop.eup %921 }
 0x7fe   :  { %v713_v7 = vmul.f32 %v920_v1, %v712_v4  ;;  %v719_v8 = vmul.f32 %v922_v6, %v707_v10  ;;  %vm725_vm7 = vweird.f32 %v922_v6 }
 0x7ff   :  { %vm726_vm9 = vmor %vm724_vm8, %vm725_vm7 }
 0x800   :  { %v717_v12 = vsel %vm716_vm6, %v920_v1, %v713_v7  ;;  %v720_v13 = vmul.f32 %v922_v6, %v719_v8 }
 0x801   :  { %v728_v14 = vmul.f32 %v717_v12, %v694_v49 }
 0x802   :  { %v721_v16 = vmul.f32 0.5, %v720_v13 }
 0x803   :  { %v731_v17 = vmul.f32 %v899_v9, %v728_v14 }
 0x804   :  { %v722_v18 = vsub.f32 1.5, %v721_v16 }
 0x805   :  { %v734_v19 = vadd.f32 %v900_v15, %v731_v17 }
 0x806   :  { %v723_v20 = vmul.f32 %v922_v6, %v722_v18 }
 0x807   :  { %844 = vmatmul.msk.f32.vlgmr.msrb.gmra.mxu1 %vm73_vm1, %v734_v19 }
 0x808   :  { %v727_v21 = vsel %vm726_vm9, %v922_v6, %v723_v20 }
 0x809   :  { %v729_v43 = vmul.f32 %v727_v21, %v695_v56 }
 0x80b   :  { %v732_v48 = vmul.f32 %v899_v9, %v729_v43 }
 0x80d   :  { %v735_v22 = vadd.f32 %v900_v15, %v732_v48 }
 0x80f   :  { %845 = vmatmul.msk.f32.gmra.mxu1 %vm73_vm1, %v735_v22 }
 0x884   :  { %v766_v26 = vpop.f32.mrf.mxu1 }
 0x885   :  { %v772_v27 = vmul.f32 %v766_v26, %v741_v23 }
 0x887   :  { %v774_v28 = vrot.slane %v772_v27, 4 }
 0x889   :  { %v775_v31 = vadd.f32 %v774_v28, %v772_v27 }
 0x88b   :  { %v776_v34 = vrot.slane %v775_v31, 2 }
 0x88c   :  { %v769_v35 = vpop.f32.mrf.mxu1 }
 0x88d   :  { %v777_v25 = vadd.f32 %v776_v34, %v775_v31  ;;  %v773_v36 = vmul.f32 %v769_v35, %v742_v32 }
 0x88f   :  { %v778_v29 = vrot.slane %v777_v25, 1  ;;  %v782_v30 = vrot.slane %v773_v36, 4 }
 0x891   :  { %v779_v33 = vadd.f32 %v778_v29, %v777_v25  ;;  %v783_v37 = vadd.f32 %v782_v30, %v773_v36 }
 0x893   :  { %v784_v38 = vrot.slane %v783_v37, 2  ;;  %v780_v39 = vadd.f32 %v779_v33, %v740_v24 }
 0x895   :  { %v785_v40 = vadd.f32 %v784_v38, %v783_v37  ;;  %781 = vst [vmem:[#allocation2] sm:$0x1] %v780_v39 }
 0x897   :  { %v786_v41 = vrot.slane %v785_v40, 1 }
 0x899   :  { %v787_v42 = vadd.f32 %v786_v41, %v785_v40 }
 0x89b   :  { %v788_v44 = vadd.f32 %v787_v42, %v740_v24 }
 0x89d   :  { %789 = vst [vmem:[#allocation2 + $0x1] sm:$0x1] %v788_v44 }
 0x89e   :  { %800 = dma.vmem_to_hbm [thread:$0]  %s796_s27, 32, %s798_s21, [#allocation3]  }
 0x89f   :  { %947 = dma.done.wait [#allocation3], 32  }
 0x8a0   :  { %948 = vsyncadd [#allocation3], 4294967264 }
 0x8a1   :  { %805 = vsyncpa [#allocation3], 1 }

</bundles_post_ra>
